<compile_context>
chip_gen: v7x
topology: tpu7x:2x2x1
jax: 0.10.0
libtpu: 0.0.40
codegen_flags: <defaults>
</compile_context>

<pallas_src>
import jax
import jax.numpy as jnp
from jax.experimental import pallas as pl
from jax.experimental.pallas import tpu as pltpu

EPSILON = 0.1


def label_smooth_kernel(preds_ref, target_ref, loss_ref):
    # preds_ref: (TILE_N, C), target_ref: (TILE_N, 1) int32, loss_ref: (TILE_N, 1) f32
    preds = preds_ref[...].astype(jnp.float32)
    tgt = target_ref[...]                                           # (TILE_N, 1)
    tn, c = preds.shape

    # Numerically stable log-softmax building blocks (per row).
    m = jnp.max(preds, axis=-1, keepdims=True)                      # (TILE_N, 1)
    shifted = preds - m                                             # (TILE_N, C)
    lse = jnp.log(jnp.sum(jnp.exp(shifted), axis=-1, keepdims=True))  # (TILE_N, 1)

    # Reductions taken directly on preds (independent of `shifted`):
    sum_preds = jnp.sum(preds, axis=-1, keepdims=True)              # (TILE_N, 1)
    cls_idx = jax.lax.broadcasted_iota(jnp.int32, (tn, c), 1)
    preds_at_tgt = jnp.sum(
        jnp.where(cls_idx == tgt, preds, 0.0), axis=-1, keepdims=True)

    # sum_j log_prb[j] = sum_j preds[j] - C*(m + lse)
    row_sum_logp = sum_preds - c * (m + lse)
    # log_prb at the target class.
    logp_at_tgt = preds_at_tgt - m - lse

    # loss = -[(1-eps) * logp_t + eps/(C-1) * sum_{j != t} logp_j]
    #      = -[((1-eps) - eps/(C-1)) * logp_t + eps/(C-1) * sum_j logp_j]
    off_w = EPSILON / (c - 1)
    tgt_w = (1.0 - EPSILON) - off_w
    loss_ref[...] = -(tgt_w * logp_at_tgt + off_w * row_sum_logp)


def _round_up(x, m):
    return (x + m - 1) // m * m


def label_smooth2(preds, target, *, max_tile_n=4096):
    """preds: (N, C) float array (f32 or bf16), target: (N,) int -> (N,) f32 loss."""
    n, c = preds.shape
    assert c >= 2, "LabelSmooth2 requires at least 2 classes (divides by C-1)."
    target2d = target.astype(jnp.int32).reshape(n, 1)

    # Size TILE_N from a conservative VMEM budget: ~5 live (TILE_N, C) f32
    # slabs (double-buffered input + in-kernel temporaries) under ~12 MiB,
    # which fits default scoped VMEM on v5e/v6e and v7x's 64 MiB physical VMEM.
    budget_elems = (12 * 1024 * 1024) // (4 * 5)
    tile_n = max(8, min(max_tile_n, budget_elems // c))
    tile_n = _round_up(min(tile_n, _round_up(n, 8)), 8)

    padded_n = _round_up(n, tile_n)
    if padded_n != n:
        preds = jnp.pad(preds, ((0, padded_n - n), (0, 0)))
        target2d = jnp.pad(target2d, ((0, padded_n - n), (0, 0)))
    num_tiles = padded_n // tile_n

    cost = pl.CostEstimate(
        flops=7 * padded_n * c,
        transcendentals=padded_n * c + 2 * padded_n,
        bytes_accessed=int(preds.dtype.itemsize) * padded_n * c + 8 * padded_n,
    )

    loss = pl.pallas_call(
        label_smooth_kernel,
        out_shape=jax.ShapeDtypeStruct((padded_n, 1), jnp.float32),
        grid=(num_tiles,),
        in_specs=[
            pl.BlockSpec((tile_n, c), lambda i: (i, 0)),
            pl.BlockSpec((tile_n, 1), lambda i: (i, 0)),
        ],
        out_specs=pl.BlockSpec((tile_n, 1), lambda i: (i, 0)),
        compiler_params=pltpu.CompilerParams(
            dimension_semantics=("parallel",),
            vmem_limit_bytes=32 * 1024 * 1024,
        ),
        cost_estimate=cost,
    )(preds, target2d)

    return loss[:n, 0]


def _reference(preds, target, eps=EPSILON):
    c = preds.shape[-1]
    one_hot = jax.nn.one_hot(target, c, dtype=jnp.float32)
    smooth = one_hot * (1 - eps) + (1 - one_hot) * eps / (c - 1)
    return -(smooth * jax.nn.log_softmax(preds.astype(jnp.float32), axis=-1)).sum(-1)


if __name__ == "__main__":
    key = jax.random.PRNGKey(0)
    kp, kt = jax.random.split(key)

    # Small case (single tile).
    N, C = 8, 32
    preds = jax.random.normal(kp, (N, C), dtype=jnp.float32)
    target = jax.random.randint(kt, (N,), 0, C, dtype=jnp.int32)

    loss = label_smooth2(preds, target)
    jax.block_until_ready(loss)
    ref = _reference(preds, target)
    assert jnp.allclose(loss, ref, atol=1e-4, rtol=1e-4), (loss, ref)

    # Multi-tile + padding case (N not a multiple of the tile, several tiles).
    N2, C2 = 300, 40
    kp2, kt2 = jax.random.split(jax.random.PRNGKey(1))
    preds2 = jax.random.normal(kp2, (N2, C2), dtype=jnp.float32)
    target2 = jax.random.randint(kt2, (N2,), 0, C2, dtype=jnp.int32)

    loss2 = label_smooth2(preds2, target2, max_tile_n=128)
    jax.block_until_ready(loss2)
    ref2 = _reference(preds2, target2)
    assert jnp.allclose(loss2, ref2, atol=1e-4, rtol=1e-4), (loss2, ref2)

    # bf16 input path (cast to f32 inside the kernel).
    preds3 = preds2.astype(jnp.bfloat16)
    loss3 = label_smooth2(preds3, target2)
    jax.block_until_ready(loss3)
    ref3 = _reference(preds3, target2)
    assert jnp.allclose(loss3, ref3, atol=2e-2, rtol=2e-2), (loss3, ref3)

    print("KERNEL_OK")
</pallas_src>

<mosaic_0001>
module attributes {stable_mosaic.version = 11 : i64} {
  func.func @label_smooth_kernel(%arg0: i32, %arg1: memref<8x32xf32, #tpu.memory_space<vmem>>, %arg2: memref<8x1xi32, #tpu.memory_space<vmem>>, %arg3: memref<8x1xf32, #tpu.memory_space<vmem>>) attributes {dimension_semantics = [#tpu.dimension_semantics<parallel>], iteration_bounds = array<i64: 1>, scalar_prefetch = 0 : i64, scratch_operands = 0 : i64, tpu.core_type = #tpu.core_type<tc>, window_params = [{transform_indices = @transform_0, window_bounds = array<i64: 8, 32>}, {transform_indices = @transform_1, window_bounds = array<i64: 8, 1>}, {transform_indices = @transform_2, window_bounds = array<i64: 8, 1>}]} {
    %c0 = arith.constant 0 : index
    %c0_0 = arith.constant 0 : index
    %0 = vector.load %arg1[%c0, %c0_0] : memref<8x32xf32, #tpu.memory_space<vmem>>, vector<8x32xf32>
    %c0_1 = arith.constant 0 : index
    %c0_2 = arith.constant 0 : index
    %1 = vector.load %arg2[%c0_1, %c0_2] : memref<8x1xi32, #tpu.memory_space<vmem>>, vector<8x1xi32>
    %cst = arith.constant dense<0xFF800000> : vector<8xf32>
    %2 = vector.multi_reduction <maximumf>, %0, %cst [1] : vector<8x32xf32> to vector<8xf32>
    %3 = vector.shape_cast %2 : vector<8xf32> to vector<8x1xf32>
    %4 = vector.broadcast %3 : vector<8x1xf32> to vector<8x32xf32>
    %5 = arith.subf %0, %4 : vector<8x32xf32>
    %6 = math.exp %5 : vector<8x32xf32>
    %cst_3 = arith.constant dense<0.000000e+00> : vector<8xf32>
    %7 = vector.multi_reduction <add>, %6, %cst_3 [1] : vector<8x32xf32> to vector<8xf32>
    %8 = vector.shape_cast %7 : vector<8xf32> to vector<8x1xf32>
    %9 = math.log %8 : vector<8x1xf32>
    %cst_4 = arith.constant dense<0.000000e+00> : vector<8xf32>
    %10 = vector.multi_reduction <add>, %0, %cst_4 [1] : vector<8x32xf32> to vector<8xf32>
    %11 = vector.shape_cast %10 : vector<8xf32> to vector<8x1xf32>
    %12 = tpu.iota {dimensions = array<i32: 1>} : vector<8x32xi32>
    %13 = vector.broadcast %1 : vector<8x1xi32> to vector<8x32xi32>
    %14 = arith.cmpi eq, %12, %13 : vector<8x32xi32>
    %cst_5 = arith.constant 0.000000e+00 : f32
    %15 = vector.broadcast %cst_5 : f32 to vector<8x32xf32>
    %16 = arith.select %14, %0, %15 : vector<8x32xi1>, vector<8x32xf32>
    %cst_6 = arith.constant dense<0.000000e+00> : vector<8xf32>
    %17 = vector.multi_reduction <add>, %16, %cst_6 [1] : vector<8x32xf32> to vector<8xf32>
    %18 = vector.shape_cast %17 : vector<8xf32> to vector<8x1xf32>
    %19 = arith.addf %3, %9 : vector<8x1xf32>
    %cst_7 = arith.constant 3.200000e+01 : f32
    %20 = vector.broadcast %cst_7 : f32 to vector<8x1xf32>
    %21 = arith.mulf %20, %19 : vector<8x1xf32>
    %22 = arith.subf %11, %21 : vector<8x1xf32>
    %23 = arith.subf %18, %3 : vector<8x1xf32>
    %24 = arith.subf %23, %9 : vector<8x1xf32>
    %cst_8 = arith.constant 0.896774172 : f32
    %25 = vector.broadcast %cst_8 : f32 to vector<8x1xf32>
    %26 = arith.mulf %25, %24 : vector<8x1xf32>
    %cst_9 = arith.constant 0.0032258064 : f32
    %27 = vector.broadcast %cst_9 : f32 to vector<8x1xf32>
    %28 = arith.mulf %27, %22 : vector<8x1xf32>
    %29 = arith.addf %26, %28 : vector<8x1xf32>
    %cst_10 = arith.constant 0.000000e+00 : f32
    %30 = vector.broadcast %cst_10 : f32 to vector<8x1xf32>
    %31 = arith.subf %30, %29 : vector<8x1xf32>
    %c0_11 = arith.constant 0 : index
    %c0_12 = arith.constant 0 : index
    %32 = vector.load %arg3[%c0_11, %c0_12] : memref<8x1xf32, #tpu.memory_space<vmem>>, vector<8x1xf32>
    tpu.vector_store %arg3[%c0_11, %c0_12], %31 {strides = array<i32>} : memref<8x1xf32, #tpu.memory_space<vmem>>, vector<8x1xf32>,
    return
  }
  func.func @transform_0(%arg0: i32) -> (i32, i32) {
    %c0_i32 = arith.constant 0 : i32
    %c0_i32_0 = arith.constant 0 : i32
    return %arg0, %c0_i32 : i32, i32
  }
  func.func @transform_1(%arg0: i32) -> (i32, i32) {
    %c0_i32 = arith.constant 0 : i32
    %c0_i32_0 = arith.constant 0 : i32
    return %arg0, %c0_i32 : i32, i32
  }
  func.func @transform_2(%arg0: i32) -> (i32, i32) {
    %c0_i32 = arith.constant 0 : i32
    %c0_i32_0 = arith.constant 0 : i32
    return %arg0, %c0_i32 : i32, i32
  }
}

</mosaic_0001>

<bundles_post_ra>
// kernel: tpu_custom_call.1
= control target key start
LH: loop header
LB: loop body
LE: loop exit
PB: predicated region body
PF: predicated region fallthrough
CT: control target
= control target key end

     0   :  { %vm13_vm0 = vcmask 261120   ;;  %v59_v1 = vmov 0   ;;  %v28_v7 = vlaneseq  ;;  %vm47_vm2 = vcmask 7168   ;;  %s88_s0 = inlined_call_operand.vmem [shape: f32[8,32], index: 0, kind: input, shape index: {}]   ;;  %s89_s1 = inlined_call_operand.vmem [shape: s32[8,1], index: 1, kind: input, shape index: {}]   ;;  %s90_s2 = inlined_call_operand.vmem [shape: f32[8,1], index: 2, kind: output, shape index: {}]  }
   0x1   :  { %v11_v0 = vld [vmem:[%s88_s0] sm:$0xff]  ;;  %54 = vset.pattern.permute.xlu0 %v59_v1 }
   0x2   :  { %v14_v2 = vsel %vm13_vm0, %v11_v0, -inf  ;;  %v12_v3 = vld [vmem:[%s89_s1] sm:$0xff]  ;;  %v29_v8 = vand.u32 127, %v28_v7  ;;  %v25_v14 = vsel %vm13_vm0, %v11_v0, 0.0 }
   0x3   :  { %15 = vmax.xlane.f32.xlu0 %v14_v2 }
  0x19   :  { %31 = vperm.xlu0 %54, %v12_v3  }
  0x90   :  { %v16_v4 = vpop.xlane.xlu0 %15 }
  0x91   :  { %v17_v5 = vsub.f32 %v11_v0, %v16_v4 }
  0x93   :  { %v18_v6 = vmul.f32 1.442695, %v17_v5 }
  0x95   :  { %55 = vpow2.f32 %v18_v6 }
  0x98   :  { %v32_v9 = vpop.permute.xlu0 %31 }
  0x99   :  { %vm33_vm1 = vcmp.eq.s32.totalorder %v29_v8, %v32_v9 }
  0x9a   :  { %v34_v11 = vsel %vm33_vm1, %v11_v0, 0.0 }
  0x9b   :  { %v35_v13 = vsel %vm13_vm0, %v34_v11, 0.0 }
  0x9f   :  { %v56_v10 = vpop.eup %55 }
  0xa0   :  { %v20_v12 = vsel %vm13_vm0, %v56_v10, 0.0 }
  0xa1   :  { %21 = vadd.xlane.f32.xlu1 %v20_v12 }
  0xa5   :  { %36 = vadd.xlane.f32.xlu1 %v35_v13 }
  0xa9   :  { %26 = vadd.xlane.f32.xlu1 %v25_v14 }
 0x12e   :  { %v22_v15 = vpop.xlane.xlu1 %21 }
 0x12f   :  { %57 = vlog2.f32 %v22_v15 }
 0x132   :  { %v37_v17 = vpop.xlane.xlu1 %36 }
 0x133   :  { %v41_v19 = vsub.f32 %v37_v17, %v16_v4 }
 0x136   :  { %v27_v21 = vpop.xlane.xlu1 %26 }
 0x139   :  { %v58_v16 = vpop.eup %57 }
 0x13a   :  { %v24_v18 = vmul.f32 0.6931472, %v58_v16 }
 0x13c   :  { %v38_v20 = vadd.f32 %v24_v18, %v16_v4  ;;  %v42_v22 = vsub.f32 %v41_v19, %v24_v18 }
 0x13e   :  { %v39_v23 = vmul.f32 32.0, %v38_v20  ;;  %v43_v25 = vmul.f32 0.8967742, %v42_v22 }
 0x140   :  { %v40_v24 = vsub.f32 %v27_v21, %v39_v23 }
 0x142   :  { %v44_v26 = vmul.f32 0.0032258064, %v40_v24 }
 0x144   :  { %v45_v27 = vadd.f32 %v44_v26, %v43_v25 }
 0x146   :  { %v46_v28 = vsub.f32 0.0, %v45_v27 }
 0x148   :  { %48 = vst.msk [vmem:[%s90_s2] sm:$0xff] %vm47_vm2, %v46_v28 }

</bundles_post_ra>
